<compile_context>
chip_gen: v6e
topology: v6e:2x2x1
jax: 0.10.0
libtpu: 0.0.40
codegen_flags: <defaults>
</compile_context>

<pallas_src>
import functools

import jax
import jax.numpy as jnp
import numpy as np
from jax.experimental import pallas as pl
from jax.experimental.pallas import tpu as pltpu

GCC_INPUT_DIM = 5
FRAME_FEAT_DIM = 16
HIDDEN = 64
FEC_OUT = 10
LN_EPS = 1e-5
OUT_W = 16      # fused output width: [bitrate | fec(10) | zero pad]
SCAL_W = 8      # packed scalar input width: [loss, rtt, gcc(5), zero pad]
BRANCH_W = 24   # fused scalar-branch width: [loss(8) | rtt(8) | gcc(8)]
GROUP = 8       # LayerNorm group width for the scalar branches

# Row layout of the packed (VEC_ROWS, 128) parameter-vector slab.
ROW_FT_B = 0
ROW_SCAL_B = 1
ROW_SCAL_G = 2
ROW_SCAL_BETA = 3
ROW_JOINT_B = 4
ROW_JOINT_G = 5
ROW_JOINT_BETA = 6
ROW_HEAD1_B = 7
ROW_HEAD2_B = 8
VEC_ROWS = 16   # padded to a multiple of 8 sublanes


def _round_up(x, m):
  return (x + m - 1) // m * m


def fecnet_kernel(frame_ref, scal_ref, wf_ref, ws_ref, wj_ref,
                  wh1_ref, wh2_ref, vec_ref, out_ref):
  f32 = jnp.float32

  def vrow(row, n):
    return vec_ref[row:row + 1, 0:n]                          # (1, n)

  # Frame branch: mean-pool folded into the weight -> one lane-dense matmul.
  frame_feat = (
      jnp.dot(frame_ref[...], wf_ref[...], preferred_element_type=f32)
      + vrow(ROW_FT_B, FRAME_FEAT_DIM))                       # (B, 16)

  # loss/rtt/gcc branches fused: ONE (8 -> 24) matmul + one bias + one ReLU.
  scal = scal_ref[...]                                        # (B, 8)
  pre = jnp.maximum(
      jnp.dot(scal, ws_ref[0:SCAL_W, :], preferred_element_type=f32)
      + vrow(ROW_SCAL_B, BRANCH_W), 0.0)                      # (B, 24)

  # Grouped LayerNorm (one 8-wide group per branch) via a block-diagonal
  # averaging matmul: keeps all three branches lane-resident (no lane slicing
  # or relayout, no partial-width XLU reductions).
  m_avg = ws_ref[SCAL_W:SCAL_W + BRANCH_W, :]                 # (24, 24)
  mu = jnp.dot(pre, m_avg, preferred_element_type=f32)
  d = pre - mu
  var = jnp.dot(d * d, m_avg, preferred_element_type=f32)
  scal_feat = (d * jax.lax.rsqrt(var + LN_EPS) * vrow(ROW_SCAL_G, BRANCH_W)
               + vrow(ROW_SCAL_BETA, BRANCH_W))               # (B, 24)

  # joint_processor: cat([frame|loss|rtt|gcc]) @ W as two partial matmuls
  # against 8-aligned row slices of the stacked weight (avoids a lane concat).
  joint_pre = (
      jnp.dot(frame_feat, wj_ref[0:FRAME_FEAT_DIM, :],
              preferred_element_type=f32)
      + jnp.dot(scal_feat, wj_ref[FRAME_FEAT_DIM:FRAME_FEAT_DIM + BRANCH_W, :],
                preferred_element_type=f32)
      + vrow(ROW_JOINT_B, HIDDEN))                            # (B, 64)
  h = jnp.maximum(joint_pre, 0.0)
  mu_j = jnp.mean(h, axis=-1, keepdims=True)
  var_j = jnp.mean((h - mu_j) ** 2, axis=-1, keepdims=True)
  merged = ((h - mu_j) * jax.lax.rsqrt(var_j + LN_EPS)
            * vrow(ROW_JOINT_G, HIDDEN) + vrow(ROW_JOINT_BETA, HIDDEN))

  # Heads: both first layers fused into one 128-wide matmul ...
  head_h = jnp.maximum(
      jnp.dot(merged, wh1_ref[...], preferred_element_type=f32)
      + vrow(ROW_HEAD1_B, 2 * HIDDEN), 0.0)                   # (B, 128)
  # ... and both second layers + both outputs fused into one (128, 16) matmul
  # with a single lane-dense (B, 16) store.
  out = (jnp.dot(head_h, wh2_ref[...], preferred_element_type=f32)
         + vrow(ROW_HEAD2_B, OUT_W))                          # (B, 16)
  col = jax.lax.broadcasted_iota(jnp.int32, out.shape, 1)
  is_fec = jnp.logical_and(col >= 1, col < 1 + FEC_OUT)
  out_ref[...] = jnp.where(is_fec, jax.nn.sigmoid(out), out)


def init_params(key, frame_input_dim):
  """Deterministic synthetic parameters. Weights stored as (in, out)."""
  def dense(k, d_in, d_out, scale=0.1):
    kw, kb = jax.random.split(k)
    w = scale * jax.random.normal(kw, (d_in, d_out), jnp.float32)
    b = scale * jax.random.normal(kb, (1, d_out), jnp.float32)
    return w, b

  keys = jax.random.split(key, 16)
  p = {}
  p["ft_w"], p["ft_b"] = dense(keys[0], frame_input_dim, FRAME_FEAT_DIM)

  p["loss_w"], p["loss_b"] = dense(keys[1], 1, 8)
  p["loss_g"] = jnp.ones((1, 8), jnp.float32)
  p["loss_beta"] = jnp.zeros((1, 8), jnp.float32)

  p["rtt_w"], p["rtt_b"] = dense(keys[2], 1, 8)
  p["rtt_g"] = jnp.ones((1, 8), jnp.float32)
  p["rtt_beta"] = jnp.zeros((1, 8), jnp.float32)

  p["gcc_w"], p["gcc_b"] = dense(keys[3], GCC_INPUT_DIM, 8)
  p["gcc_g"] = jnp.ones((1, 8), jnp.float32)
  p["gcc_beta"] = jnp.zeros((1, 8), jnp.float32)

  merged_dim = FRAME_FEAT_DIM + 8 * 3
  joint_w, p["joint_b"] = dense(keys[4], merged_dim, HIDDEN)
  # Pre-split joint weight along the concat axis: [frame|loss|rtt|gcc].
  p["jw_frame"] = joint_w[0:16, :]
  p["jw_loss"] = joint_w[16:24, :]
  p["jw_rtt"] = joint_w[24:32, :]
  p["jw_gcc"] = joint_w[32:40, :]
  p["joint_g"] = jnp.ones((1, HIDDEN), jnp.float32)
  p["joint_beta"] = jnp.zeros((1, HIDDEN), jnp.float32)

  p["br1_w"], p["br1_b"] = dense(keys[5], HIDDEN, HIDDEN)
  p["br2_w"], p["br2_b"] = dense(keys[6], HIDDEN, 1)

  p["fec1_w"], p["fec1_b"] = dense(keys[7], HIDDEN, HIDDEN)
  p["fec2_w"], p["fec2_b"] = dense(keys[8], HIDDEN, FEC_OUT)
  return p


def pack_params(params, seq_len):
  """Pack the ~28 tiny parameter arrays into a few DMA-friendly slabs."""
  f32 = jnp.float32

  # Frame linear with the mean pool over the sequence folded into the weight.
  w_frame = jnp.tile(params["ft_w"].astype(f32), (seq_len, 1)) / float(seq_len)

  # Fused scalar-branch weight (packed scalar lanes -> [loss|rtt|gcc] lanes),
  # stacked on top of the block-diagonal averaging matrix used by the grouped
  # LayerNorm -> one (32, 24) slab.
  w_scal = np.zeros((SCAL_W, BRANCH_W), np.float32)
  w_scal[0, 0:8] = np.asarray(params["loss_w"], np.float32)[0]
  w_scal[1, 8:16] = np.asarray(params["rtt_w"], np.float32)[0]
  w_scal[2:2 + GCC_INPUT_DIM, 16:24] = np.asarray(params["gcc_w"], np.float32)
  m_avg = np.kron(np.eye(BRANCH_W // GROUP, dtype=np.float32),
                  np.full((GROUP, GROUP), 1.0 / GROUP, np.float32))
  w_scal_stack = jnp.asarray(np.concatenate([w_scal, m_avg], axis=0))  # (32,24)

  # Joint weight stacked on K in order [frame | loss | rtt | gcc].
  w_joint = jnp.concatenate(
      [params["jw_frame"], params["jw_loss"],
       params["jw_rtt"], params["jw_gcc"]], axis=0).astype(f32)       # (40, 64)

  # Head first layers fused to (64, 128); second layers fused to (128, 16).
  w_head1 = jnp.concatenate([params["br1_w"], params["fec1_w"]],
                            axis=1).astype(f32)                       # (64, 128)
  w_head2 = jnp.zeros((2 * HIDDEN, OUT_W), f32)
  w_head2 = w_head2.at[0:HIDDEN, 0].set(params["br2_w"][:, 0].astype(f32))
  w_head2 = w_head2.at[HIDDEN:, 1:1 + FEC_OUT].set(
      params["fec2_w"].astype(f32))

  b_scal = jnp.concatenate(
      [params["loss_b"], params["rtt_b"], params["gcc_b"]], axis=1)
  g_scal = jnp.concatenate(
      [params["loss_g"], params["rtt_g"], params["gcc_g"]], axis=1)
  beta_scal = jnp.concatenate(
      [params["loss_beta"], params["rtt_beta"], params["gcc_beta"]], axis=1)
  b_head1 = jnp.concatenate([params["br1_b"], params["fec1_b"]], axis=1)
  b_head2 = jnp.zeros((1, OUT_W), f32)
  b_head2 = b_head2.at[0, 0].set(params["br2_b"][0, 0])
  b_head2 = b_head2.at[0, 1:1 + FEC_OUT].set(params["fec2_b"][0, :])

  vec = jnp.zeros((VEC_ROWS, 128), f32)

  def put(v, row, arr):
    arr = jnp.asarray(arr, f32).reshape(-1)
    return v.at[row, :arr.shape[0]].set(arr)

  vec = put(vec, ROW_FT_B, params["ft_b"])
  vec = put(vec, ROW_SCAL_B, b_scal)
  vec = put(vec, ROW_SCAL_G, g_scal)
  vec = put(vec, ROW_SCAL_BETA, beta_scal)
  vec = put(vec, ROW_JOINT_B, params["joint_b"])
  vec = put(vec, ROW_JOINT_G, params["joint_g"])
  vec = put(vec, ROW_JOINT_BETA, params["joint_beta"])
  vec = put(vec, ROW_HEAD1_B, b_head1)
  vec = put(vec, ROW_HEAD2_B, b_head2)

  return {
      "w_frame": w_frame,       # (S*F, 16)
      "w_scal": w_scal_stack,   # (32, 24)  [branch weight | avg matrix]
      "w_joint": w_joint,       # (40, 64)
      "w_head1": w_head1,       # (64, 128)
      "w_head2": w_head2,       # (128, 16)
      "vec": vec,               # (16, 128)
  }


@functools.partial(jax.jit, static_argnames=())
def fecnet_forward(packed, frame_seq, loss_rate, rtt, gcc_features):
  """Returns (bitrate [B], fec_ratios [B, 10])."""
  B, S, F = frame_seq.shape
  sf = S * F

  # Batch tile: multiple of 8, bounded by a ~4 MiB per-block input budget
  # (x2 for double-buffering) so it is safe on v7x/v5e scoped-VMEM limits.
  row_bytes = 4 * (sf + SCAL_W + OUT_W)
  blk_cap = max(8, ((4 * 1024 * 1024) // row_bytes) // 8 * 8)
  blk_b = int(min(blk_cap, 1024, _round_up(B, 8)))
  b_pad = _round_up(B, blk_b)

  frame_flat = jnp.zeros((b_pad, sf), jnp.float32)
  frame_flat = frame_flat.at[:B].set(
      frame_seq.reshape(B, sf).astype(jnp.float32))
  scal = jnp.zeros((b_pad, SCAL_W), jnp.float32)
  scal = scal.at[:B, 0].set(loss_rate.reshape(B).astype(jnp.float32))
  scal = scal.at[:B, 1].set(rtt.reshape(B).astype(jnp.float32))
  scal = scal.at[:B, 2:2 + GCC_INPUT_DIM].set(
      gcc_features.astype(jnp.float32))

  def batch_map(i):
    return (i, 0)

  def const_map(i):
    return (0, 0)

  param_arrays = (packed["w_frame"], packed["w_scal"], packed["w_joint"],
                  packed["w_head1"], packed["w_head2"], packed["vec"])
  param_specs = [pl.BlockSpec(p.shape, const_map) for p in param_arrays]

  flops = 2 * b_pad * (sf * FRAME_FEAT_DIM + SCAL_W * BRANCH_W
                       + 2 * BRANCH_W * BRANCH_W + 40 * HIDDEN
                       + HIDDEN * 2 * HIDDEN + 2 * HIDDEN * OUT_W)
  bytes_accessed = 4 * (b_pad * (sf + SCAL_W + OUT_W)
                        + sum(int(np.prod(p.shape)) for p in param_arrays))

  out = pl.pallas_call(
      fecnet_kernel,
      out_shape=jax.ShapeDtypeStruct((b_pad, OUT_W), jnp.float32),
      grid=(b_pad // blk_b,),
      in_specs=[pl.BlockSpec((blk_b, sf), batch_map),
                pl.BlockSpec((blk_b, SCAL_W), batch_map)] + param_specs,
      out_specs=pl.BlockSpec((blk_b, OUT_W), batch_map),
      compiler_params=pltpu.CompilerParams(
          dimension_semantics=("parallel",),
          vmem_limit_bytes=16 * 1024 * 1024),
      cost_estimate=pl.CostEstimate(
          flops=flops,
          transcendentals=b_pad * (FEC_OUT + BRANCH_W + HIDDEN),
          bytes_accessed=bytes_accessed),
  )(frame_flat, scal, *param_arrays)

  bitrate = out[:B, 0]                 # .squeeze(-1)
  fec_ratios = out[:B, 1:1 + FEC_OUT]
  return bitrate, fec_ratios


def fecnet_reference(params, frame_seq, loss_rate, rtt, gcc_features):
  """Pure-JAX reference of the same forward (same frame_transformer stand-in)."""
  B = frame_seq.shape[0]
  f32 = jnp.float32

  def fc_ln(x, w, b, g, beta):
    h = jnp.maximum(x @ w + b, 0.0)
    mu = jnp.mean(h, axis=-1, keepdims=True)
    var = jnp.mean((h - mu) ** 2, axis=-1, keepdims=True)
    return (h - mu) * jax.lax.rsqrt(var + LN_EPS) * g + beta

  pooled = jnp.mean(frame_seq.astype(f32), axis=1)
  frame_feat = pooled @ params["ft_w"] + params["ft_b"]
  loss_feat = fc_ln(loss_rate.reshape(B, 1).astype(f32), params["loss_w"],
                    params["loss_b"], params["loss_g"], params["loss_beta"])
  rtt_feat = fc_ln(rtt.reshape(B, 1).astype(f32), params["rtt_w"],
                   params["rtt_b"], params["rtt_g"], params["rtt_beta"])
  gcc_feat = fc_ln(gcc_features.astype(f32), params["gcc_w"], params["gcc_b"],
                   params["gcc_g"], params["gcc_beta"])
  merged = jnp.concatenate([frame_feat, loss_feat, rtt_feat, gcc_feat], axis=1)
  jw = jnp.concatenate([params["jw_frame"], params["jw_loss"],
                        params["jw_rtt"], params["jw_gcc"]], axis=0)
  merged = fc_ln(merged, jw, params["joint_b"], params["joint_g"],
                 params["joint_beta"])
  br_h = jnp.maximum(merged @ params["br1_w"] + params["br1_b"], 0.0)
  bitrate = (br_h @ params["br2_w"] + params["br2_b"])[:, 0]
  fec_h = jnp.maximum(merged @ params["fec1_w"] + params["fec1_b"], 0.0)
  fec = jax.nn.sigmoid(fec_h @ params["fec2_w"] + params["fec2_b"])
  return bitrate, fec


if __name__ == "__main__":
  key = jax.random.PRNGKey(0)
  k_param, k_frame, k_loss, k_rtt, k_gcc = jax.random.split(key, 5)

  B, S, F = 2, 8, 4   # batch, frame-sequence length, per-frame feature dim
  params = init_params(k_param, frame_input_dim=F)
  packed = pack_params(params, seq_len=S)

  frame_seq = jax.random.normal(k_frame, (B, S, F), jnp.float32)
  loss_rate = jax.random.uniform(k_loss, (B,), jnp.float32)
  rtt = jax.random.uniform(k_rtt, (B,), jnp.float32)
  gcc_features = jax.random.normal(k_gcc, (B, GCC_INPUT_DIM), jnp.float32)

  bitrate, fec_ratios = fecnet_forward(packed, frame_seq, loss_rate, rtt,
                                       gcc_features)
  jax.block_until_ready((bitrate, fec_ratios))

  assert bitrate.shape == (B,)
  assert fec_ratios.shape == (B, FEC_OUT)
  assert bool(jnp.all(jnp.isfinite(bitrate)))
  assert bool(jnp.all((fec_ratios >= 0.0) & (fec_ratios <= 1.0)))

  # Cross-check against the pure-JAX reference of the same forward.  Tolerance
  # allows for TPU default-precision f32 matmul paths on the MXU.
  ref_bitrate, ref_fec = fecnet_reference(params, frame_seq, loss_rate, rtt,
                                          gcc_features)
  np.testing.assert_allclose(np.asarray(bitrate), np.asarray(ref_bitrate),
                             rtol=5e-3, atol=5e-3)
  np.testing.assert_allclose(np.asarray(fec_ratios), np.asarray(ref_fec),
                             rtol=5e-3, atol=5e-3)

  print("KERNEL_OK")
</pallas_src>

<mosaic_0001>
module attributes {stable_mosaic.version = 11 : i64} {
  func.func @fecnet_kernel(%arg0: i32, %arg1: memref<8x32xf32, #tpu.memory_space<vmem>>, %arg2: memref<8x8xf32, #tpu.memory_space<vmem>>, %arg3: memref<32x16xf32, #tpu.memory_space<vmem>>, %arg4: memref<32x24xf32, #tpu.memory_space<vmem>>, %arg5: memref<40x64xf32, #tpu.memory_space<vmem>>, %arg6: memref<64x128xf32, #tpu.memory_space<vmem>>, %arg7: memref<128x16xf32, #tpu.memory_space<vmem>>, %arg8: memref<16x128xf32, #tpu.memory_space<vmem>>, %arg9: memref<8x16xf32, #tpu.memory_space<vmem>>) attributes {dimension_semantics = [#tpu.dimension_semantics<parallel>], iteration_bounds = array<i64: 1>, scalar_prefetch = 0 : i64, scratch_operands = 0 : i64, tpu.core_type = #tpu.core_type<tc>, window_params = [{transform_indices = @transform_0, window_bounds = array<i64: 8, 32>}, {transform_indices = @transform_1, window_bounds = array<i64: 8, 8>}, {pipeline_mode = #tpu.pipeline_mode<synchronous>, transform_indices = @transform_2, window_bounds = array<i64: 32, 16>}, {pipeline_mode = #tpu.pipeline_mode<synchronous>, transform_indices = @transform_3, window_bounds = array<i64: 32, 24>}, {pipeline_mode = #tpu.pipeline_mode<synchronous>, transform_indices = @transform_4, window_bounds = array<i64: 40, 64>}, {pipeline_mode = #tpu.pipeline_mode<synchronous>, transform_indices = @transform_5, window_bounds = array<i64: 64, 128>}, {pipeline_mode = #tpu.pipeline_mode<synchronous>, transform_indices = @transform_6, window_bounds = array<i64: 128, 16>}, {pipeline_mode = #tpu.pipeline_mode<synchronous>, transform_indices = @transform_7, window_bounds = array<i64: 16, 128>}, {transform_indices = @transform_8, window_bounds = array<i64: 8, 16>}]} {
    %c0 = arith.constant 0 : index
    %c0_0 = arith.constant 0 : index
    %0 = vector.load %arg1[%c0, %c0_0] : memref<8x32xf32, #tpu.memory_space<vmem>>, vector<8x32xf32>
    %c0_1 = arith.constant 0 : index
    %c0_2 = arith.constant 0 : index
    %1 = vector.load %arg3[%c0_1, %c0_2] : memref<32x16xf32, #tpu.memory_space<vmem>>, vector<32x16xf32>
    %cst = arith.constant dense<0.000000e+00> : vector<8x16xf32>
    %2 = tpu.matmul %0, %1, %cst {dimension_numbers = #tpu.dot_dimension_numbers<[1], [0], [0], [1], [0, 0, 1, 1], [], []>} : vector<8x32xf32>, vector<32x16xf32>, vector<8x16xf32> -> vector<8x16xf32>
    %c0_3 = arith.constant 0 : index
    %c0_4 = arith.constant 0 : index
    %3 = vector.load %arg8[%c0_3, %c0_4] : memref<16x128xf32, #tpu.memory_space<vmem>>, vector<1x16xf32>
    %4 = vector.broadcast %3 : vector<1x16xf32> to vector<8x16xf32>
    %5 = arith.addf %2, %4 : vector<8x16xf32>
    %c0_5 = arith.constant 0 : index
    %c0_6 = arith.constant 0 : index
    %6 = vector.load %arg2[%c0_5, %c0_6] : memref<8x8xf32, #tpu.memory_space<vmem>>, vector<8x8xf32>
    %c0_7 = arith.constant 0 : index
    %c0_8 = arith.constant 0 : index
    %7 = vector.load %arg4[%c0_7, %c0_8] : memref<32x24xf32, #tpu.memory_space<vmem>>, vector<8x24xf32>
    %cst_9 = arith.constant dense<0.000000e+00> : vector<8x24xf32>
    %8 = tpu.matmul %6, %7, %cst_9 {dimension_numbers = #tpu.dot_dimension_numbers<[1], [0], [0], [1], [0, 0, 1, 1], [], []>} : vector<8x8xf32>, vector<8x24xf32>, vector<8x24xf32> -> vector<8x24xf32>
    %c1 = arith.constant 1 : index
    %c0_10 = arith.constant 0 : index
    %9 = vector.load %arg8[%c1, %c0_10] : memref<16x128xf32, #tpu.memory_space<vmem>>, vector<1x24xf32>
    %10 = vector.broadcast %9 : vector<1x24xf32> to vector<8x24xf32>
    %11 = arith.addf %8, %10 : vector<8x24xf32>
    %cst_11 = arith.constant 0.000000e+00 : f32
    %12 = vector.broadcast %cst_11 : f32 to vector<8x24xf32>
    %13 = arith.maximumf %11, %12 : vector<8x24xf32>
    %c8 = arith.constant 8 : index
    %c0_12 = arith.constant 0 : index
    %14 = vector.load %arg4[%c8, %c0_12] : memref<32x24xf32, #tpu.memory_space<vmem>>, vector<24x24xf32>
    %cst_13 = arith.constant dense<0.000000e+00> : vector<8x24xf32>
    %15 = tpu.matmul %13, %14, %cst_13 {dimension_numbers = #tpu.dot_dimension_numbers<[1], [0], [0], [1], [0, 0, 1, 1], [], []>} : vector<8x24xf32>, vector<24x24xf32>, vector<8x24xf32> -> vector<8x24xf32>
    %16 = arith.subf %13, %15 : vector<8x24xf32>
    %17 = arith.mulf %16, %16 : vector<8x24xf32>
    %cst_14 = arith.constant dense<0.000000e+00> : vector<8x24xf32>
    %18 = tpu.matmul %17, %14, %cst_14 {dimension_numbers = #tpu.dot_dimension_numbers<[1], [0], [0], [1], [0, 0, 1, 1], [], []>} : vector<8x24xf32>, vector<24x24xf32>, vector<8x24xf32> -> vector<8x24xf32>
    %cst_15 = arith.constant 9.99999974E-6 : f32
    %19 = vector.broadcast %cst_15 : f32 to vector<8x24xf32>
    %20 = arith.addf %18, %19 : vector<8x24xf32>
    %21 = math.rsqrt %20 : vector<8x24xf32>
    %22 = arith.mulf %16, %21 : vector<8x24xf32>
    %c2 = arith.constant 2 : index
    %c0_16 = arith.constant 0 : index
    %23 = vector.load %arg8[%c2, %c0_16] : memref<16x128xf32, #tpu.memory_space<vmem>>, vector<1x24xf32>
    %24 = vector.broadcast %23 : vector<1x24xf32> to vector<8x24xf32>
    %25 = arith.mulf %22, %24 : vector<8x24xf32>
    %c3 = arith.constant 3 : index
    %c0_17 = arith.constant 0 : index
    %26 = vector.load %arg8[%c3, %c0_17] : memref<16x128xf32, #tpu.memory_space<vmem>>, vector<1x24xf32>
    %27 = vector.broadcast %26 : vector<1x24xf32> to vector<8x24xf32>
    %28 = arith.addf %25, %27 : vector<8x24xf32>
    %c0_18 = arith.constant 0 : index
    %c0_19 = arith.constant 0 : index
    %29 = vector.load %arg5[%c0_18, %c0_19] : memref<40x64xf32, #tpu.memory_space<vmem>>, vector<16x64xf32>
    %cst_20 = arith.constant dense<0.000000e+00> : vector<8x64xf32>
    %30 = tpu.matmul %5, %29, %cst_20 {dimension_numbers = #tpu.dot_dimension_numbers<[1], [0], [0], [1], [0, 0, 1, 1], [], []>} : vector<8x16xf32>, vector<16x64xf32>, vector<8x64xf32> -> vector<8x64xf32>
    %c16 = arith.constant 16 : index
    %c0_21 = arith.constant 0 : index
    %31 = vector.load %arg5[%c16, %c0_21] : memref<40x64xf32, #tpu.memory_space<vmem>>, vector<24x64xf32>
    %cst_22 = arith.constant dense<0.000000e+00> : vector<8x64xf32>
    %32 = tpu.matmul %28, %31, %cst_22 {dimension_numbers = #tpu.dot_dimension_numbers<[1], [0], [0], [1], [0, 0, 1, 1], [], []>} : vector<8x24xf32>, vector<24x64xf32>, vector<8x64xf32> -> vector<8x64xf32>
    %33 = arith.addf %30, %32 : vector<8x64xf32>
    %c4 = arith.constant 4 : index
    %c0_23 = arith.constant 0 : index
    %34 = vector.load %arg8[%c4, %c0_23] : memref<16x128xf32, #tpu.memory_space<vmem>>, vector<1x64xf32>
    %35 = vector.broadcast %34 : vector<1x64xf32> to vector<8x64xf32>
    %36 = arith.addf %33, %35 : vector<8x64xf32>
    %cst_24 = arith.constant 0.000000e+00 : f32
    %37 = vector.broadcast %cst_24 : f32 to vector<8x64xf32>
    %38 = arith.maximumf %36, %37 : vector<8x64xf32>
    %cst_25 = arith.constant dense<0.000000e+00> : vector<8xf32>
    %39 = vector.multi_reduction <add>, %38, %cst_25 [1] : vector<8x64xf32> to vector<8xf32>
    %40 = vector.shape_cast %39 : vector<8xf32> to vector<8x1xf32>
    %cst_26 = arith.constant 6.400000e+01 : f32
    %41 = vector.broadcast %cst_26 : f32 to vector<8x1xf32>
    %42 = arith.divf %40, %41 : vector<8x1xf32>
    %43 = vector.broadcast %42 : vector<8x1xf32> to vector<8x64xf32>
    %44 = arith.subf %38, %43 : vector<8x64xf32>
    %45 = arith.mulf %44, %44 : vector<8x64xf32>
    %cst_27 = arith.constant dense<0.000000e+00> : vector<8xf32>
    %46 = vector.multi_reduction <add>, %45, %cst_27 [1] : vector<8x64xf32> to vector<8xf32>
    %47 = vector.shape_cast %46 : vector<8xf32> to vector<8x1xf32>
    %cst_28 = arith.constant 6.400000e+01 : f32
    %48 = vector.broadcast %cst_28 : f32 to vector<8x1xf32>
    %49 = arith.divf %47, %48 : vector<8x1xf32>
    %50 = vector.broadcast %42 : vector<8x1xf32> to vector<8x64xf32>
    %51 = arith.subf %38, %50 : vector<8x64xf32>
    %cst_29 = arith.constant 9.99999974E-6 : f32
    %52 = vector.broadcast %cst_29 : f32 to vector<8x1xf32>
    %53 = arith.addf %49, %52 : vector<8x1xf32>
    %54 = math.rsqrt %53 : vector<8x1xf32>
    %55 = vector.broadcast %54 : vector<8x1xf32> to vector<8x64xf32>
    %56 = arith.mulf %51, %55 : vector<8x64xf32>
    %c5 = arith.constant 5 : index
    %c0_30 = arith.constant 0 : index
    %57 = vector.load %arg8[%c5, %c0_30] : memref<16x128xf32, #tpu.memory_space<vmem>>, vector<1x64xf32>
    %58 = vector.broadcast %57 : vector<1x64xf32> to vector<8x64xf32>
    %59 = arith.mulf %56, %58 : vector<8x64xf32>
    %c6 = arith.constant 6 : index
    %c0_31 = arith.constant 0 : index
    %60 = vector.load %arg8[%c6, %c0_31] : memref<16x128xf32, #tpu.memory_space<vmem>>, vector<1x64xf32>
    %61 = vector.broadcast %60 : vector<1x64xf32> to vector<8x64xf32>
    %62 = arith.addf %59, %61 : vector<8x64xf32>
    %c0_32 = arith.constant 0 : index
    %c0_33 = arith.constant 0 : index
    %63 = vector.load %arg6[%c0_32, %c0_33] : memref<64x128xf32, #tpu.memory_space<vmem>>, vector<64x128xf32>
    %cst_34 = arith.constant dense<0.000000e+00> : vector<8x128xf32>
    %64 = tpu.matmul %62, %63, %cst_34 {dimension_numbers = #tpu.dot_dimension_numbers<[1], [0], [0], [1], [0, 0, 1, 1], [], []>} : vector<8x64xf32>, vector<64x128xf32>, vector<8x128xf32> -> vector<8x128xf32>
    %c7 = arith.constant 7 : index
    %c0_35 = arith.constant 0 : index
    %65 = vector.load %arg8[%c7, %c0_35] : memref<16x128xf32, #tpu.memory_space<vmem>>, vector<1x128xf32>
    %66 = vector.broadcast %65 : vector<1x128xf32> to vector<8x128xf32>
    %67 = arith.addf %64, %66 : vector<8x128xf32>
    %cst_36 = arith.constant 0.000000e+00 : f32
    %68 = vector.broadcast %cst_36 : f32 to vector<8x128xf32>
    %69 = arith.maximumf %67, %68 : vector<8x128xf32>
    %c0_37 = arith.constant 0 : index
    %c0_38 = arith.constant 0 : index
    %70 = vector.load %arg7[%c0_37, %c0_38] : memref<128x16xf32, #tpu.memory_space<vmem>>, vector<128x16xf32>
    %cst_39 = arith.constant dense<0.000000e+00> : vector<8x16xf32>
    %71 = tpu.matmul %69, %70, %cst_39 {dimension_numbers = #tpu.dot_dimension_numbers<[1], [0], [0], [1], [0, 0, 1, 1], [], []>} : vector<8x128xf32>, vector<128x16xf32>, vector<8x16xf32> -> vector<8x16xf32>
    %c8_40 = arith.constant 8 : index
    %c0_41 = arith.constant 0 : index
    %72 = vector.load %arg8[%c8_40, %c0_41] : memref<16x128xf32, #tpu.memory_space<vmem>>, vector<1x16xf32>
    %73 = vector.broadcast %72 : vector<1x16xf32> to vector<8x16xf32>
    %74 = arith.addf %71, %73 : vector<8x16xf32>
    %75 = tpu.iota {dimensions = array<i32: 1>} : vector<8x16xi32>
    %c1_i32 = arith.constant 1 : i32
    %76 = vector.broadcast %c1_i32 : i32 to vector<8x16xi32>
    %77 = arith.cmpi sge, %75, %76 : vector<8x16xi32>
    %c11_i32 = arith.constant 11 : i32
    %78 = vector.broadcast %c11_i32 : i32 to vector<8x16xi32>
    %79 = arith.cmpi slt, %75, %78 : vector<8x16xi32>
    %80 = arith.andi %77, %79 : vector<8x16xi1>
    %81 = arith.negf %74 : vector<8x16xf32>
    %82 = math.exp %81 : vector<8x16xf32>
    %cst_42 = arith.constant 1.000000e+00 : f32
    %83 = vector.broadcast %cst_42 : f32 to vector<8x16xf32>
    %84 = arith.addf %83, %82 : vector<8x16xf32>
    %85 = arith.divf %83, %84 : vector<8x16xf32>
    %86 = arith.select %80, %85, %74 : vector<8x16xi1>, vector<8x16xf32>
    %c0_43 = arith.constant 0 : index
    %c0_44 = arith.constant 0 : index
    %87 = vector.load %arg9[%c0_43, %c0_44] : memref<8x16xf32, #tpu.memory_space<vmem>>, vector<8x16xf32>
    tpu.vector_store %arg9[%c0_43, %c0_44], %86 {strides = array<i32>} : memref<8x16xf32, #tpu.memory_space<vmem>>, vector<8x16xf32>,
    return
  }
  func.func @transform_0(%arg0: i32) -> (i32, i32) {
    %c0_i32 = arith.constant 0 : i32
    %c0_i32_0 = arith.constant 0 : i32
    return %arg0, %c0_i32 : i32, i32
  }
  func.func @transform_1(%arg0: i32) -> (i32, i32) {
    %c0_i32 = arith.constant 0 : i32
    %c0_i32_0 = arith.constant 0 : i32
    return %arg0, %c0_i32 : i32, i32
  }
  func.func @transform_2(%arg0: i32) -> (i32, i32) {
    %c0_i32 = arith.constant 0 : i32
    %c0_i32_0 = arith.constant 0 : i32
    %c0_i32_1 = arith.constant 0 : i32
    return %c0_i32, %c0_i32_0 : i32, i32
  }
  func.func @transform_3(%arg0: i32) -> (i32, i32) {
    %c0_i32 = arith.constant 0 : i32
    %c0_i32_0 = arith.constant 0 : i32
    %c0_i32_1 = arith.constant 0 : i32
    return %c0_i32, %c0_i32_0 : i32, i32
  }
  func.func @transform_4(%arg0: i32) -> (i32, i32) {
    %c0_i32 = arith.constant 0 : i32
    %c0_i32_0 = arith.constant 0 : i32
    %c0_i32_1 = arith.constant 0 : i32
    return %c0_i32, %c0_i32_0 : i32, i32
  }
  func.func @transform_5(%arg0: i32) -> (i32, i32) {
    %c0_i32 = arith.constant 0 : i32
    %c0_i32_0 = arith.constant 0 : i32
    %c0_i32_1 = arith.constant 0 : i32
    return %c0_i32, %c0_i32_0 : i32, i32
  }
  func.func @transform_6(%arg0: i32) -> (i32, i32) {
    %c0_i32 = arith.constant 0 : i32
    %c0_i32_0 = arith.constant 0 : i32
    %c0_i32_1 = arith.constant 0 : i32
    return %c0_i32, %c0_i32_0 : i32, i32
  }
  func.func @transform_7(%arg0: i32) -> (i32, i32) {
    %c0_i32 = arith.constant 0 : i32
    %c0_i32_0 = arith.constant 0 : i32
    %c0_i32_1 = arith.constant 0 : i32
    return %c0_i32, %c0_i32_0 : i32, i32
  }
  func.func @transform_8(%arg0: i32) -> (i32, i32) {
    %c0_i32 = arith.constant 0 : i32
    %c0_i32_0 = arith.constant 0 : i32
    return %arg0, %c0_i32 : i32, i32
  }
}

</mosaic_0001>

<bundles_post_ra>
// kernel: fecnet_forward.1
= control target key start
LH: loop header
LB: loop body
LE: loop exit
PB: predicated region body
PF: predicated region fallthrough
CT: control target
= control target key end

     0   :  { %v921_v0 = vmov 0.0   ;;  %vm922_vm0 = vmmov 0   ;;  %vm39_vm1 = vcmask 261120   ;;  %vm120_vm2 = vcmask 64512   ;;  %s1184_s2 = inlined_call_operand.vmem [shape: f32[32,16], index: 2, kind: input, shape index: {}]   ;;  %s1185_s0 = inlined_call_operand.vmem [shape: f32[8,32], index: 0, kind: input, shape index: {}]   ;;  %s1186_s3 = inlined_call_operand.vmem [shape: f32[32,24], index: 3, kind: input, shape index: {}]   ;;  %s1187_s1 = inlined_call_operand.vmem [shape: f32[8,8], index: 1, kind: input, shape index: {}]   ;;  %s1188_s7 = inlined_call_operand.vmem [shape: f32[16,128], index: 7, kind: input, shape index: {}]   ;;  %s1189_s4 = inlined_call_operand.vmem [shape: f32[40,64], index: 4, kind: input, shape index: {}]   ;;  %s1190_s5 = inlined_call_operand.vmem [shape: f32[64,128], index: 5, kind: input, shape index: {}]   ;;  %s1191_s6 = inlined_call_operand.vmem [shape: f32[128,16], index: 6, kind: input, shape index: {}]   ;;  %s1192_s8 = inlined_call_operand.vmem [shape: f32[8,16], index: 8, kind: output, shape index: {}]  }
   0x1   :  { %807 = vmatprep.subr.mxu1 %v921_v0  ;;  %v33_v1 = vld [vmem:[%s1184_s2 + $0x18] sm:$0xff]  ;;  %v32_v2 = vld [vmem:[%s1184_s2 + $0x10] sm:$0xff]  ;;  %815 = vmatprep.mubr.msk.f32.mxu1 %vm922_vm0, %v921_v0  ;;  %v31_v3 = vld [vmem:[%s1184_s2 + $0x8] sm:$0xff]  ;;  %vm198_vm3 = vcmask 195584   ;;  %vm439_vm4 = vcmask 130048   ;;  %vm520_vm5 = vcmask 523264  }
   0x2   :  { %808 = vmatpush3.msra.mxu1 %v33_v1  ;;  %832 = vmatprep.subr.mxu0 %v921_v0  ;;  %v30_v4 = vld [vmem:[%s1184_s2] sm:$0xff]  ;;  %v197_v8 = vld [vmem:[%s1186_s3 + $0x18] sm:$0xff]  ;;  %v196_v9 = vld [vmem:[%s1186_s3 + $0x10] sm:$0xff] }
   0x3   :  { %809 = vmatprep.subr.mxu1 %v921_v0  ;;  %838 = vmatprep.mubr.msk.f32.mxu0 %vm922_vm0, %v921_v0  ;;  %v29_v5 = vld [vmem:[%s1185_s0] sm:$0xff]  ;;  %v195_v10 = vld [vmem:[%s1186_s3 + $0x8] sm:$0xff]  ;;  %v364_v27 = vld [vmem:[%s1189_s4 + $0x18] sm:$0xff] }
   0x4   :  { %810 = vmatpush3.msra.mxu1 %v32_v2  ;;  %v114_v6 = vld [vmem:[%s1186_s3] sm:$0xff]  ;;  %833 = vmatpush3.msra.mxu0 %v197_v8  ;;  %v362_v22 = vld [vmem:[%s1189_s4 + $0x8] sm:$0xff]  ;;  %v363_v28 = vld [vmem:[%s1189_s4 + $0x10] sm:$0xff] }
   0x5   :  { %811 = vmatprep.subr.mxu1 %v921_v0  ;;  %v113_v7 = vld [vmem:[%s1187_s1] sm:$0xff]  ;;  %834 = vmatprep.subr.mxu0 %v921_v0  ;;  %v554_v52 = vld [vmem:[%s1190_s5 + $0x38] sm:$0xff]  ;;  %v553_v53 = vld [vmem:[%s1190_s5 + $0x30] sm:$0xff] }
   0x6   :  { %812 = vmatpush3.msra.mxu1 %v31_v3  ;;  %835 = vmatpush3.msra.mxu0 %v196_v9  ;;  %v744_v13 = vld [vmem:[%s1188_s7 + $0x1] ss:$0 sm:$0xff]  ;;  %v742_v23 = vld [vmem:[%s1188_s7] ss:$0 sm:$0xff]  ;;  %v748_v35 = vld [vmem:[%s1188_s7 + $0x2] ss:$0 sm:$0xff] }
   0x7   :  { %813 = vmatprep.subr.mxu1 %v921_v0  ;;  %836 = vmatprep.subr.mxu0 %v921_v0  ;;  %v361_v24 = vld [vmem:[%s1189_s4] sm:$0xff]  ;;  %v552_v54 = vld [vmem:[%s1190_s5 + $0x28] sm:$0xff]  ;;  %v550_v56 = vld [vmem:[%s1190_s5 + $0x18] sm:$0xff] }
   0x8   :  { %814 = vmatpush3.msra.mxu1 %v30_v4  ;;  %837 = vmatpush3.msra.mxu0 %v195_v10  ;;  %v365_v26 = vld [vmem:[%s1189_s4 + $0x20] sm:$0xff]  ;;  %v549_v57 = vld [vmem:[%s1190_s5 + $0x10] sm:$0xff]  ;;  %v548_v58 = vld [vmem:[%s1190_s5 + $0x8] sm:$0xff] }
   0x9   :  { %816 = vmatmul.mubr.msk.f32.vlgmr.msra.gmra.mxu1 %vm39_vm1, %v29_v5  ;;  %818 = vmatprep.subr.mxu1 %v921_v0  ;;  %v749_v37 = vld [vmem:[%s1188_s7 + $0x3] ss:$0 sm:$0xff]  ;;  %v752_v41 = vld [vmem:[%s1188_s7 + $0x4] ss:$0 sm:$0xff]  ;;  %v649_v60 = vld [vmem:[%s1191_s6 + $0x78] sm:$0xff] }
   0xa   :  { %819 = vmatpush3.msra.mxu1 %v114_v6  ;;  %820 = vmatprep.mubr.msk.f32.mxu1 %vm922_vm0, %v921_v0  ;;  %v551_v55 = vld [vmem:[%s1190_s5 + $0x20] sm:$0xff]  ;;  %v648_v61 = vld [vmem:[%s1191_s6 + $0x70] sm:$0xff]  ;;  %v647_v62 = vld [vmem:[%s1191_s6 + $0x68] sm:$0xff] }
   0xb   :  { %823 = vmatprep.subr.mxu1 %v921_v0  ;;  %850 = vmatprep.subr.mxu0 %v921_v0  ;;  %v547_v59 = vld [vmem:[%s1190_s5] sm:$0xff]  ;;  %v645_v1 = vld [vmem:[%s1191_s6 + $0x58] sm:$0xff]  ;;  %v644_v2 = vld [vmem:[%s1191_s6 + $0x50] sm:$0xff] }
   0xc   :  { %v646_v63 = vld [vmem:[%s1191_s6 + $0x60] sm:$0xff]  ;;  %v643_v3 = vld [vmem:[%s1191_s6 + $0x48] sm:$0xff]  ;;  %v641_v5 = vld [vmem:[%s1191_s6 + $0x38] sm:$0xff] }
   0xd   :  { %821 = vmatmul.mubr.msk.f32.vlgmr.msra.gmra.mxu1 %vm120_vm2, %v113_v7  ;;  %v642_v4 = vld [vmem:[%s1191_s6 + $0x40] sm:$0xff]  ;;  %v640_v6 = vld [vmem:[%s1191_s6 + $0x30] sm:$0xff]  ;;  %v639_v7 = vld [vmem:[%s1191_s6 + $0x28] sm:$0xff] }
   0xe   :  { %829 = vmatprep.mubr.msk.f32.mxu1 %vm922_vm0, %v921_v0  ;;  %824 = vmatpush3.msra.mxu1 %v197_v8  ;;  %v638_v8 = vld [vmem:[%s1191_s6 + $0x20] sm:$0xff] }
   0xf   :  { %825 = vmatprep.subr.mxu1 %v921_v0 }
  0x10   :  { %826 = vmatpush3.msra.mxu1 %v196_v9  ;;  %v637_v9 = vld [vmem:[%s1191_s6 + $0x18] sm:$0xff] }
  0x11   :  { %827 = vmatprep.subr.mxu1 %v921_v0 }
  0x12   :  { %828 = vmatpush3.msra.mxu1 %v195_v10 }
  0x13   :  { %841 = vmatprep.subr.mxu1 %v921_v0 }
  0xc9   :  { %v109_v11 = vpop.f32.mrf.mxu1 }
  0xca   :  { %v110_v25 = vadd.f32 %v742_v23, %v109_v11 }
  0xcb   :  { %v817_v12 = vpop.f32.mrf.mxu1 }
  0xcd   :  { %v190_v14 = vpop.f32.mrf.mxu1 }
  0xce   :  { %v191_v15 = vadd.f32 %v744_v13, %v190_v14  ;;  %v753_v14 = vld [vmem:[%s1188_s7 + $0x5] ss:$0 sm:$0xff] }
  0xcf   :  { %v822_v16 = vpop.f32.mrf.mxu1 }
  0xd0   :  { %v194_v17 = vmax.f32 %v191_v15, 0.0  ;;  %v754_v16 = vld [vmem:[%s1188_s7 + $0x6] ss:$0 sm:$0xff] }
  0xd2   :  { %830 = vmatmul.mubr.msk.f32.vlgmr.msra.gmra.mxu1 %vm198_vm3, %v194_v17 }
  0xd3   :  { %847 = vmatprep.mubr.msk.f32.mxu1 %vm922_vm0, %v921_v0  ;;  %842 = vmatpush3.msra.mxu1 %v365_v26 }
  0xd4   :  { %843 = vmatprep.subr.mxu1 %v921_v0 }
  0xd5   :  { %844 = vmatpush3.msra.mxu1 %v364_v27  ;;  %v757_v27 = vld [vmem:[%s1188_s7 + $0x8] ss:$0 sm:$0xff] }
  0xd6   :  { %845 = vmatprep.subr.mxu1 %v921_v0 }
  0xd7   :  { %846 = vmatpush3.msra.mxu1 %v363_v28 }
  0xd8   :  { %857 = vmatprep.subr.mxu1 %v921_v0 }
 0x192   :  { %v268_v18 = vpop.f32.mrf.mxu1 }
 0x193   :  { %v272_v19 = vsub.f32 %v194_v17, %v268_v18 }
 0x194   :  { %v831_v20 = vpop.f32.mrf.mxu1 }
 0x195   :  { %v273_v21 = vmul.f32 %v272_v19, %v272_v19  ;;  %v635_v20 = vld [vmem:[%s1191_s6 + $0x8] sm:$0xff] }
 0x197   :  { %839 = vmatmul.mubr.msk.f32.vlgmr.msra.gmra.mxu0 %vm198_vm3, %v273_v21  ;;  %v634_v21 = vld [vmem:[%s1191_s6] sm:$0xff] }
 0x198   :  { %851 = vmatpush3.msra.mxu0 %v362_v22  ;;  %854 = vmatprep.mubr.msk.f32.mxu0 %vm922_vm0, %v921_v0  ;;  %v755_v22 = vld [vmem:[%s1188_s7 + $0x7] ss:$0 sm:$0xff] }
 0x199   :  { %852 = vmatprep.subr.mxu0 %v921_v0 }
 0x19a   :  { %853 = vmatpush3.msra.mxu0 %v361_v24 }
 0x19b   :  { %855 = vmatmul.mubr.msk.f32.vlgmr.msra.gmra.mxu0 %vm439_vm4, %v110_v25  ;;  %876 = vmatprep.subr.mxu0 %v921_v0 }
 0x19c   :  { %908 = vmatprep.mubr.msk.f32.mxu0 %vm922_vm0, %v921_v0  ;;  %877 = vmatpush3.msra.mxu0 %v649_v60 }
 0x19d   :  { %878 = vmatprep.subr.mxu0 %v921_v0 }
 0x19e   :  { %879 = vmatpush3.msra.mxu0 %v648_v61 }
 0x19f   :  { %880 = vmatprep.subr.mxu0 %v921_v0 }
 0x1a0   :  { %881 = vmatpush3.msra.mxu0 %v647_v62 }
 0x1a1   :  { %882 = vmatprep.subr.mxu0 %v921_v0 }
 0x1a2   :  { %883 = vmatpush3.msra.mxu0 %v646_v63 }
 0x1a3   :  { %884 = vmatprep.subr.mxu0 %v921_v0 }
 0x1a4   :  { %885 = vmatpush3.msra.mxu0 %v645_v1 }
 0x1a5   :  { %886 = vmatprep.subr.mxu0 %v921_v0 }
 0x1a6   :  { %887 = vmatpush3.msra.mxu0 %v644_v2 }
 0x1a7   :  { %888 = vmatprep.subr.mxu0 %v921_v0 }
 0x1a8   :  { %889 = vmatpush3.msra.mxu0 %v643_v3 }
 0x1a9   :  { %890 = vmatprep.subr.mxu0 %v921_v0 }
 0x1aa   :  { %891 = vmatpush3.msra.mxu0 %v642_v4 }
 0x1ab   :  { %892 = vmatprep.subr.mxu0 %v921_v0 }
 0x1ac   :  { %893 = vmatpush3.msra.mxu0 %v641_v5 }
 0x1ad   :  { %894 = vmatprep.subr.mxu0 %v921_v0 }
 0x1ae   :  { %895 = vmatpush3.msra.mxu0 %v640_v6 }
 0x1af   :  { %896 = vmatprep.subr.mxu0 %v921_v0 }
 0x1b0   :  { %897 = vmatpush3.msra.mxu0 %v639_v7 }
 0x1b1   :  { %898 = vmatprep.subr.mxu0 %v921_v0 }
 0x1b2   :  { %899 = vmatpush3.msra.mxu0 %v638_v8 }
 0x1b3   :  { %900 = vmatprep.subr.mxu0 %v921_v0 }
 0x1b4   :  { %901 = vmatpush3.msra.mxu0 %v637_v9 }
 0x1b5   :  { %902 = vmatprep.subr.mxu0 %v921_v0 }
 0x257   :  { %v343_v29 = vpop.f32.mrf.mxu0 }
 0x258   :  { %v344_v30 = vadd.f32 1e-05, %v343_v29 }
 0x259   :  { %v840_v31 = vpop.f32.mrf.mxu0 }
 0x25a   :  { %913 = vrsqrt.f32 %v344_v30 }
 0x25b   :  { %v509_v32 = vpop.f32.mrf.mxu0 }
 0x25d   :  { %v856_v33 = vpop.f32.mrf.mxu0 }
 0x25e   :  { %v725_v33 = vlaneseq }
 0x267   :  { %v914_v34 = vpop.eup %913 }
 0x268   :  { %v348_v36 = vmul.f32 %v914_v34, %v272_v19  ;;  %v636_v19 = vld [vmem:[%s1191_s6 + $0x10] sm:$0xff]  ;;  %v726_v34 = vand.u32 127, %v725_v33 }
 0x269   :  { %903 = vmatpush3.msra.mxu0 %v636_v19 }
 0x26a   :  { %v354_v38 = vmul.f32 %v748_v35, %v348_v36  ;;  %904 = vmatprep.subr.mxu0 %v921_v0  ;;  %vm727_vm6 = vcmp.ge.s32.totalorder %v726_v34, 1  ;;  %vm728_vm7 = vcmp.lt.s32.totalorder %v726_v34, 11 }
 0x26b   :  { %905 = vmatpush3.msra.mxu0 %v635_v20  ;;  %vm729_vm8 = vmand %vm727_vm6, %vm728_vm7 }
 0x26c   :  { %v360_v39 = vadd.f32 %v749_v37, %v354_v38  ;;  %906 = vmatprep.subr.mxu0 %v921_v0 }
 0x26d   :  { %907 = vmatpush3.msra.mxu0 %v634_v21 }
 0x26e   :  { %848 = vmatmul.mubr.msk.f32.vlgmr.msra.gmra.mxu1 %vm198_vm3, %v360_v39 }
 0x26f   :  { %873 = vmatprep.mubr.msk.f32.mxu1 %vm922_vm0, %v921_v0  ;;  %858 = vmatpush3.msra.mxu1 %v554_v52 }
 0x270   :  { %859 = vmatprep.subr.mxu1 %v921_v0 }
 0x271   :  { %860 = vmatpush3.msra.mxu1 %v553_v53 }
 0x272   :  { %861 = vmatprep.subr.mxu1 %v921_v0 }
 0x273   :  { %862 = vmatpush3.msra.mxu1 %v552_v54 }
 0x274   :  { %863 = vmatprep.subr.mxu1 %v921_v0 }
 0x275   :  { %864 = vmatpush3.msra.mxu1 %v551_v55 }
 0x276   :  { %865 = vmatprep.subr.mxu1 %v921_v0 }
 0x277   :  { %866 = vmatpush3.msra.mxu1 %v550_v56 }
 0x278   :  { %867 = vmatprep.subr.mxu1 %v921_v0 }
 0x279   :  { %868 = vmatpush3.msra.mxu1 %v549_v57 }
 0x27a   :  { %869 = vmatprep.subr.mxu1 %v921_v0 }
 0x27b   :  { %870 = vmatpush3.msra.mxu1 %v548_v58 }
 0x27c   :  { %871 = vmatprep.subr.mxu1 %v921_v0 }
 0x27d   :  { %872 = vmatpush3.msra.mxu1 %v547_v59 }
 0x32e   :  { %v435_v40 = vpop.f32.mrf.mxu1 }
 0x32f   :  { %v510_v42 = vadd.f32 %v509_v32, %v435_v40 }
 0x330   :  { %v849_v43 = vpop.f32.mrf.mxu1 }
 0x331   :  { %v518_v44 = vadd.f32 %v752_v41, %v510_v42 }
 0x333   :  { %v519_v45 = vmax.f32 %v518_v44, 0.0 }
 0x335   :  { %v521_v46 = vsel %vm520_vm5, %v519_v45, 0.0 }
 0x336   :  { %522 = vadd.xlane.f32.xlu0 %v521_v46 }
 0x3bf   :  { %v523_v47 = vpop.xlane.xlu0 %522 }
 0x3c0   :  { %v525_v48 = vmul.f32 0.015625, %v523_v47 }
 0x3c2   :  { %v1067_v49 = vsub.f32 %v519_v45, %v525_v48 }
 0x3c4   :  { %v527_v50 = vmul.f32 %v1067_v49, %v1067_v49 }
 0x3c6   :  { %v528_v51 = vsel %vm520_vm5, %v527_v50, 0.0 }
 0x3c7   :  { %529 = vadd.xlane.f32.xlu0 %v528_v51 }
 0x450   :  { %v530_v10 = vpop.xlane.xlu0 %529 }
 0x451   :  { %v531_v11 = vmul.f32 0.015625, %v530_v10 }
 0x453   :  { %v532_v12 = vadd.f32 1e-05, %v531_v11 }
 0x455   :  { %915 = vrsqrt.f32 %v532_v12 }
 0x462   :  { %v916_v13 = vpop.eup %915 }
 0x463   :  { %v534_v15 = vmul.f32 %v916_v13, %v1067_v49 }
 0x465   :  { %v540_v17 = vmul.f32 %v753_v14, %v534_v15 }
 0x467   :  { %v546_v18 = vadd.f32 %v754_v16, %v540_v17 }
 0x469   :  { %874 = vmatmul.mubr.msk.f32.vlgmr.msra.gmra.mxu1 %vm520_vm5, %v546_v18 }
 0x529   :  { %v629_v23 = vpop.f32.mrf.mxu1 }
 0x52a   :  { %v630_v24 = vadd.f32 %v755_v22, %v629_v23 }
 0x52b   :  { %v875_v25 = vpop.f32.mrf.mxu1 }
 0x52c   :  { %v633_v26 = vmax.f32 %v630_v24, 0.0 }
 0x52e   :  { %909 = vmatmul.mubr.f32.vlgmr.msra.gmra.mxu0 %v633_v26 }
 0x5ee   :  { %v721_v28 = vpop.f32.mrf.mxu0 }
 0x5ef   :  { %v722_v0 = vadd.f32 %v757_v27, %v721_v28 }
 0x5f0   :  { %v910_v29 = vpop.f32.mrf.mxu0 }
 0x5f1   :  { %v758_v30 = vmul.f32 -1.442695, %v722_v0 }
 0x5f3   :  { %917 = vpow2.f32 %v758_v30 }
 0x600   :  { %v918_v31 = vpop.eup %917 }
 0x601   :  { %v733_v32 = vadd.f32 1.0, %v918_v31 }
 0x603   :  { %919 = vrcp.f32 %v733_v32 }
 0x610   :  { %v920_v35 = vpop.eup %919 }
 0x611   :  { %v736_v36 = vsel %vm729_vm8, %v920_v35, %v722_v0 }
 0x612   :  { %737 = vst.msk [vmem:[%s1192_s8] sm:$0xff] %vm439_vm4, %v736_v36 }

</bundles_post_ra>
